<compile_context>
chip_gen: v7x
topology: tpu7x:2x2x1
jax: 0.10.0
libtpu: 0.0.40
codegen_flags: <defaults>
</compile_context>

<pallas_src>
import math

import jax
import jax.numpy as jnp
import numpy as np
from jax.experimental import pallas as pl
from jax.experimental.pallas import tpu as pltpu

# Rows of the packed per-batch scalar table (prefetched into SMEM).
_SIGMA, _T, _C_SKIP, _C_IN, _INV_COUT = range(5)


def _make_kernel(C: int, H: int, inv_total: float):
    def vk_forward_kernel(scal_ref,          # SMEM (5, B): sigma / t / c_skip / c_in / 1/(c_out+1e-7)
                          x_ref, n_ref,      # VMEM (C, T_TILE): batch dim squeezed, time on lanes
                          wb1_ref,           # VMEM (H, C+2): [W1^T | b1 | temb]
                          wb2_ref,           # VMEM (C, H+1): [W2^T | b2]
                          loss_ref,          # (1, 1) output, resident across the whole grid
                          acc_ref):          # (1, 1) f32 VMEM scratch accumulator
        b = pl.program_id(0)
        ti = pl.program_id(1)

        @pl.when(jnp.logical_and(b == 0, ti == 0))
        def _init():
            acc_ref[...] = jnp.zeros_like(acc_ref)

        # Per-batch scalars (precomputed in the wrapper, read from SMEM).
        sigma = scal_ref[_SIGMA, b]
        t_val = scal_ref[_T, b]
        c_skip = scal_ref[_C_SKIP, b]
        c_in = scal_ref[_C_IN, b]
        inv_cout = scal_ref[_INV_COUT, b]

        # Streams may be bf16 in HBM; all math is f32 in-register.
        x = x_ref[...].astype(jnp.float32)          # (C, T_TILE)
        noise = n_ref[...].astype(jnp.float32)      # (C, T_TILE)

        x_noisy = x + sigma * noise
        x_in = c_in * x_noisy

        # Unpack the fused weight tiles (static slices, tiny).
        w1t = wb1_ref[:, :C]                 # (H, C)
        b1 = wb1_ref[:, C:C + 1]             # (H, 1)
        temb = wb1_ref[:, C + 1:C + 2]       # (H, 1)
        w2t = wb2_ref[:, :H]                 # (C, H)
        b2 = wb2_ref[:, H:H + 1]             # (C, 1)

        # Synthetic net: per-position channel MLP with additive time embedding.
        h = jnp.dot(w1t, x_in, preferred_element_type=jnp.float32)      # (H, T_TILE)
        h = jax.nn.gelu(h + b1 + temb * t_val, approximate=True)
        x_pred = jnp.dot(w2t, h, preferred_element_type=jnp.float32) + b2   # (C, T_TILE)

        v_target = (x - c_skip * x_noisy) * inv_cout
        diff = x_pred - v_target
        acc_ref[...] += jnp.sum(diff * diff)

        @pl.when(jnp.logical_and(b == pl.num_programs(0) - 1,
                                 ti == pl.num_programs(1) - 1))
        def _finalize():
            loss_ref[...] = acc_ref[...] * inv_total

    return vk_forward_kernel


def _pick_t_tile(C: int, T: int, itemsize: int) -> int:
    """Largest lane tile (multiple of 128 dividing T) whose double-buffered
    x+noise streams stay within a conservative, v5e-safe VMEM budget."""
    if T % 128 != 0:
        return T                      # small/ragged T: one full-extent tile (legal block)
    budget = 8 << 20                  # bytes for both streamed inputs, double-buffered
    per_col = 2 * 2 * C * itemsize    # x + noise, 2 pipeline buffers each
    best = 128
    t = 128
    while t <= min(T, 8192):
        if T % t == 0 and per_col * t <= budget:
            best = t
        t *= 2
    return best


def vk_diffusion_forward(x, noise, sigmas, params):
    """x, noise: [B, C, T] (PyTorch NCW layout, f32 or bf16). Returns scalar MSE loss."""
    w1, b1, temb, w2, b2 = params
    B, C, T = x.shape
    H = w1.shape[1]

    # Per-batch scalar glue: sigma_to_t and the VK scale weights (B values,
    # trivially cheap in the wrapper), packed into one SMEM prefetch table.
    sigmas = sigmas.astype(jnp.float32)
    t = jnp.arctan(sigmas) * jnp.float32(2.0 / math.pi)     # sigma_to_t
    sig2p1 = sigmas * sigmas + 1.0                          # sigma_data = 1.0
    c_skip = 1.0 / sig2p1
    c_in = jax.lax.rsqrt(sig2p1)
    c_out = -sigmas * c_in
    inv_cout = 1.0 / (c_out + 1e-7)                         # matches reference semantics
    scal = jnp.stack([sigmas, t, c_skip, c_in, inv_cout], axis=0)   # (5, B)

    # Pack the tiny parameter tensors so the kernel takes 4 tensor inputs.
    wb1 = jnp.concatenate(
        [jnp.transpose(w1), jnp.transpose(b1), jnp.transpose(temb)], axis=1
    ).astype(jnp.float32)                                   # (H, C+2)
    wb2 = jnp.concatenate(
        [jnp.transpose(w2), jnp.transpose(b2)], axis=1
    ).astype(jnp.float32)                                   # (C, H+1)

    t_tile = _pick_t_tile(C, T, jnp.dtype(x.dtype).itemsize)
    n_t = T // t_tile
    inv_total = 1.0 / float(B * C * T)

    grid_spec = pltpu.PrefetchScalarGridSpec(
        num_scalar_prefetch=1,
        grid=(B, n_t),
        in_specs=[
            # x / noise: native [B, C, T]; batch squeezed, time on lanes.
            pl.BlockSpec((None, C, t_tile), lambda b, ti, scal: (b, 0, ti)),
            pl.BlockSpec((None, C, t_tile), lambda b, ti, scal: (b, 0, ti)),
            # Weights: grid-invariant -> DMA'd once, VMEM-resident.
            pl.BlockSpec((H, C + 2), lambda b, ti, scal: (0, 0)),
            pl.BlockSpec((C, H + 1), lambda b, ti, scal: (0, 0)),
        ],
        out_specs=pl.BlockSpec((1, 1), lambda b, ti, scal: (0, 0)),
        scratch_shapes=[pltpu.VMEM((1, 1), jnp.float32)],
    )

    loss = pl.pallas_call(
        _make_kernel(C, H, inv_total),
        out_shape=jax.ShapeDtypeStruct((1, 1), jnp.float32),
        grid_spec=grid_spec,
        compiler_params=pltpu.CompilerParams(
            # Both grid axes feed the single loss accumulator -> "arbitrary".
            dimension_semantics=("arbitrary", "arbitrary"),
            # 32 MiB: above v5e's 16 MiB scoped default, within v7x's 64 MiB
            # physical; streamed tiles are capped at <= 8 MiB by _pick_t_tile.
            vmem_limit_bytes=32 << 20,
        ),
    )(scal, x, noise, wb1, wb2)

    return loss[0, 0]


def vk_diffusion_forward_ref(x_nct, noise_nct, sigmas, params):
    """Pure-JAX reference of the same forward pass (for validation)."""
    w1, b1, temb, w2, b2 = params
    x = jnp.transpose(x_nct, (0, 2, 1)).astype(jnp.float32)        # (B, T, C)
    noise = jnp.transpose(noise_nct, (0, 2, 1)).astype(jnp.float32)
    s = sigmas[:, None, None]
    x_noisy = x + s * noise
    c_skip = 1.0 / (s * s + 1.0)
    c_in = jax.lax.rsqrt(s * s + 1.0)
    c_out = -s * c_in
    t = jnp.arctan(sigmas) / jnp.float32(math.pi) * 2.0
    h = (jnp.einsum("btc,ch->bth", c_in * x_noisy, w1)
         + b1 + t[:, None, None] * temb)
    h = jax.nn.gelu(h, approximate=True)
    x_pred = jnp.einsum("bth,hc->btc", h, w2) + b2
    v_target = (x - c_skip * x_noisy) / (c_out + 1e-7)
    return jnp.mean((x_pred - v_target) ** 2)


if __name__ == "__main__":
    # Small shapes, but T chosen so the kernel exercises multi-tile pipelining
    # (t_tile=128 -> grid=(2, 3)) and the cross-step loss accumulation.
    B, C, T, H = 2, 8, 384, 32

    key = jax.random.PRNGKey(0)
    kx, kn, ks, k1, k2, k3, k4, k5 = jax.random.split(key, 8)

    # PyTorch-style NCW inputs (noise passed explicitly: deterministic stand-in
    # for torch.randn_like; sigmas stand in for sigma_distribution()).
    x = jax.random.normal(kx, (B, C, T), dtype=jnp.float32)
    noise = jax.random.normal(kn, (B, C, T), dtype=jnp.float32)
    sigmas = jax.random.uniform(ks, (B,), minval=0.2, maxval=1.0, dtype=jnp.float32)

    # Deterministic synthetic net parameters.
    w1 = jax.random.normal(k1, (C, H), dtype=jnp.float32) * (1.0 / math.sqrt(C))
    b1 = jax.random.normal(k2, (1, H), dtype=jnp.float32) * 0.1
    temb = jax.random.normal(k3, (1, H), dtype=jnp.float32) * 0.1
    w2 = jax.random.normal(k4, (H, C), dtype=jnp.float32) * (1.0 / math.sqrt(H))
    b2 = jax.random.normal(k5, (1, C), dtype=jnp.float32) * 0.1
    params = (w1, b1, temb, w2, b2)

    loss = jax.block_until_ready(vk_diffusion_forward(x, noise, sigmas, params))
    loss_ref = jax.block_until_ready(vk_diffusion_forward_ref(x, noise, sigmas, params))

    np.testing.assert_allclose(np.asarray(loss), np.asarray(loss_ref),
                               rtol=1e-4, atol=1e-5)
    print("KERNEL_OK")
</pallas_src>

<mosaic_0001>
module attributes {stable_mosaic.version = 11 : i64} {
  func.func @vk_forward_kernel(%arg0: i32, %arg1: i32, %arg2: memref<5x2xf32, #tpu.memory_space<smem>>, %arg3: memref<1x8x128xf32, #tpu.memory_space<vmem>>, %arg4: memref<1x8x128xf32, #tpu.memory_space<vmem>>, %arg5: memref<32x10xf32, #tpu.memory_space<vmem>>, %arg6: memref<8x33xf32, #tpu.memory_space<vmem>>, %arg7: memref<1x1xf32, #tpu.memory_space<vmem>>, %arg8: memref<1x1xf32, #tpu.memory_space<vmem>>) attributes {dimension_semantics = [#tpu.dimension_semantics<arbitrary>, #tpu.dimension_semantics<arbitrary>], iteration_bounds = array<i64: 2, 3>, scalar_prefetch = 1 : i64, scratch_operands = 1 : i64, tpu.core_type = #tpu.core_type<tc>, window_params = [{transform_indices = @transform_0, window_bounds = array<i64: 1, 8, 128>}, {transform_indices = @transform_1, window_bounds = array<i64: 1, 8, 128>}, {pipeline_mode = #tpu.pipeline_mode<synchronous>, transform_indices = @transform_2, window_bounds = array<i64: 32, 10>}, {pipeline_mode = #tpu.pipeline_mode<synchronous>, transform_indices = @transform_3, window_bounds = array<i64: 8, 33>}, {pipeline_mode = #tpu.pipeline_mode<synchronous>, transform_indices = @transform_4, window_bounds = array<i64: 1, 1>}]} {
    %c0_i32 = arith.constant 0 : i32
    %0 = arith.cmpi eq, %arg0, %c0_i32 : i32
    %c0_i32_0 = arith.constant 0 : i32
    %1 = arith.cmpi eq, %arg1, %c0_i32_0 : i32
    %2 = arith.andi %0, %1 : i1
    %3 = arith.extui %2 : i1 to i32
    %c0_i32_1 = arith.constant 0 : i32
    %4 = arith.cmpi ne, %3, %c0_i32_1 : i32
    scf.if %4 {
      %cst_26 = arith.constant 0.000000e+00 : f32
      %72 = vector.broadcast %cst_26 : f32 to vector<1x1xf32>
      %c0_27 = arith.constant 0 : index
      %c0_28 = arith.constant 0 : index
      %73 = vector.load %arg8[%c0_27, %c0_28] : memref<1x1xf32, #tpu.memory_space<vmem>>, vector<1x1xf32>
      tpu.vector_store %arg8[%c0_27, %c0_28], %72 {strides = array<i32>} : memref<1x1xf32, #tpu.memory_space<vmem>>, vector<1x1xf32>,
    } else {
    }
    %c0 = arith.constant 0 : index
    %5 = arith.index_cast %arg0 : i32 to index
    %6 = memref.load %arg2[%c0, %5] : memref<5x2xf32, #tpu.memory_space<smem>>
    %c1 = arith.constant 1 : index
    %7 = arith.index_cast %arg0 : i32 to index
    %8 = memref.load %arg2[%c1, %7] : memref<5x2xf32, #tpu.memory_space<smem>>
    %c2 = arith.constant 2 : index
    %9 = arith.index_cast %arg0 : i32 to index
    %10 = memref.load %arg2[%c2, %9] : memref<5x2xf32, #tpu.memory_space<smem>>
    %c3 = arith.constant 3 : index
    %11 = arith.index_cast %arg0 : i32 to index
    %12 = memref.load %arg2[%c3, %11] : memref<5x2xf32, #tpu.memory_space<smem>>
    %c4 = arith.constant 4 : index
    %13 = arith.index_cast %arg0 : i32 to index
    %14 = memref.load %arg2[%c4, %13] : memref<5x2xf32, #tpu.memory_space<smem>>
    %c0_2 = arith.constant 0 : index
    %c0_3 = arith.constant 0 : index
    %c0_4 = arith.constant 0 : index
    %15 = vector.load %arg3[%c0_2, %c0_3, %c0_4] : memref<1x8x128xf32, #tpu.memory_space<vmem>>, vector<1x8x128xf32>
    %16 = vector.shape_cast %15 : vector<1x8x128xf32> to vector<8x128xf32>
    %c0_5 = arith.constant 0 : index
    %c0_6 = arith.constant 0 : index
    %c0_7 = arith.constant 0 : index
    %17 = vector.load %arg4[%c0_5, %c0_6, %c0_7] : memref<1x8x128xf32, #tpu.memory_space<vmem>>, vector<1x8x128xf32>
    %18 = vector.shape_cast %17 : vector<1x8x128xf32> to vector<8x128xf32>
    %19 = vector.broadcast %6 : f32 to vector<8x128xf32>
    %20 = arith.mulf %19, %18 : vector<8x128xf32>
    %21 = arith.addf %16, %20 : vector<8x128xf32>
    %22 = vector.broadcast %12 : f32 to vector<8x128xf32>
    %23 = arith.mulf %22, %21 : vector<8x128xf32>
    %c0_8 = arith.constant 0 : index
    %c0_9 = arith.constant 0 : index
    %24 = vector.load %arg5[%c0_8, %c0_9] : memref<32x10xf32, #tpu.memory_space<vmem>>, vector<32x8xf32>
    %c0_10 = arith.constant 0 : index
    %c8 = arith.constant 8 : index
    %25 = vector.load %arg5[%c0_10, %c8] : memref<32x10xf32, #tpu.memory_space<vmem>>, vector<32x1xf32>
    %c0_11 = arith.constant 0 : index
    %c9 = arith.constant 9 : index
    %26 = vector.load %arg5[%c0_11, %c9] : memref<32x10xf32, #tpu.memory_space<vmem>>, vector<32x1xf32>
    %c0_12 = arith.constant 0 : index
    %c0_13 = arith.constant 0 : index
    %27 = vector.load %arg6[%c0_12, %c0_13] : memref<8x33xf32, #tpu.memory_space<vmem>>, vector<8x32xf32>
    %c0_14 = arith.constant 0 : index
    %c32 = arith.constant 32 : index
    %28 = vector.load %arg6[%c0_14, %c32] : memref<8x33xf32, #tpu.memory_space<vmem>>, vector<8x1xf32>
    %cst = arith.constant dense<0.000000e+00> : vector<32x128xf32>
    %29 = tpu.matmul %24, %23, %cst {dimension_numbers = #tpu.dot_dimension_numbers<[1], [0], [0], [1], [0, 0, 1, 1], [], []>} : vector<32x8xf32>, vector<8x128xf32>, vector<32x128xf32> -> vector<32x128xf32>
    %30 = vector.broadcast %25 : vector<32x1xf32> to vector<32x128xf32>
    %31 = arith.addf %29, %30 : vector<32x128xf32>
    %32 = vector.broadcast %8 : f32 to vector<32x1xf32>
    %33 = arith.mulf %26, %32 : vector<32x1xf32>
    %34 = vector.broadcast %33 : vector<32x1xf32> to vector<32x128xf32>
    %35 = arith.addf %31, %34 : vector<32x128xf32>
    %36 = arith.mulf %35, %35 : vector<32x128xf32>
    %37 = arith.mulf %35, %36 : vector<32x128xf32>
    %cst_15 = arith.constant 4.471500e-02 : f32
    %38 = vector.broadcast %cst_15 : f32 to vector<32x128xf32>
    %39 = arith.mulf %38, %37 : vector<32x128xf32>
    %40 = arith.addf %35, %39 : vector<32x128xf32>
    %cst_16 = arith.constant 0.797884583 : f32
    %41 = vector.broadcast %cst_16 : f32 to vector<32x128xf32>
    %42 = arith.mulf %41, %40 : vector<32x128xf32>
    %43 = math.tanh %42 : vector<32x128xf32>
    %cst_17 = arith.constant 1.000000e+00 : f32
    %44 = vector.broadcast %cst_17 : f32 to vector<32x128xf32>
    %45 = arith.addf %44, %43 : vector<32x128xf32>
    %cst_18 = arith.constant 5.000000e-01 : f32
    %46 = vector.broadcast %cst_18 : f32 to vector<32x128xf32>
    %47 = arith.mulf %46, %45 : vector<32x128xf32>
    %48 = arith.mulf %35, %47 : vector<32x128xf32>
    %cst_19 = arith.constant dense<0.000000e+00> : vector<8x128xf32>
    %49 = tpu.matmul %27, %48, %cst_19 {dimension_numbers = #tpu.dot_dimension_numbers<[1], [0], [0], [1], [0, 0, 1, 1], [], []>} : vector<8x32xf32>, vector<32x128xf32>, vector<8x128xf32> -> vector<8x128xf32>
    %50 = vector.broadcast %28 : vector<8x1xf32> to vector<8x128xf32>
    %51 = arith.addf %49, %50 : vector<8x128xf32>
    %52 = vector.broadcast %10 : f32 to vector<8x128xf32>
    %53 = arith.mulf %52, %21 : vector<8x128xf32>
    %54 = arith.subf %16, %53 : vector<8x128xf32>
    %55 = vector.broadcast %14 : f32 to vector<8x128xf32>
    %56 = arith.mulf %54, %55 : vector<8x128xf32>
    %57 = arith.subf %51, %56 : vector<8x128xf32>
    %c0_20 = arith.constant 0 : index
    %c0_21 = arith.constant 0 : index
    %58 = vector.load %arg8[%c0_20, %c0_21] : memref<1x1xf32, #tpu.memory_space<vmem>>, vector<1x1xf32>
    %59 = arith.mulf %57, %57 : vector<8x128xf32>
    %60 = vector.shape_cast %59 : vector<8x128xf32> to vector<1x8x128xf32>
    %cst_22 = arith.constant dense<0.000000e+00> : vector<1xf32>
    %61 = vector.multi_reduction <add>, %60, %cst_22 [1, 2] : vector<1x8x128xf32> to vector<1xf32>
    %62 = vector.shape_cast %61 : vector<1xf32> to vector<1x1x1xf32>
    %63 = vector.extract %62[0, 0, 0] : f32 from vector<1x1x1xf32>
    %64 = vector.broadcast %63 : f32 to vector<1x1xf32>
    %65 = arith.addf %58, %64 : vector<1x1xf32>
    %c0_23 = arith.constant 0 : index
    %c0_24 = arith.constant 0 : index
    %66 = vector.load %arg8[%c0_23, %c0_24] : memref<1x1xf32, #tpu.memory_space<vmem>>, vector<1x1xf32>
    tpu.vector_store %arg8[%c0_23, %c0_24], %65 {strides = array<i32>} : memref<1x1xf32, #tpu.memory_space<vmem>>, vector<1x1xf32>,
    %c1_i32 = arith.constant 1 : i32
    %67 = arith.cmpi eq, %arg0, %c1_i32 : i32
    %c2_i32 = arith.constant 2 : i32
    %68 = arith.cmpi eq, %arg1, %c2_i32 : i32
    %69 = arith.andi %67, %68 : i1
    %70 = arith.extui %69 : i1 to i32
    %c0_i32_25 = arith.constant 0 : i32
    %71 = arith.cmpi ne, %70, %c0_i32_25 : i32
    scf.if %71 {
      %c0_26 = arith.constant 0 : index
      %c0_27 = arith.constant 0 : index
      %72 = vector.load %arg8[%c0_26, %c0_27] : memref<1x1xf32, #tpu.memory_space<vmem>>, vector<1x1xf32>
      %cst_28 = arith.constant 1.62760422E-4 : f32
      %73 = vector.broadcast %cst_28 : f32 to vector<1x1xf32>
      %74 = arith.mulf %72, %73 : vector<1x1xf32>
      %c0_29 = arith.constant 0 : index
      %c0_30 = arith.constant 0 : index
      %75 = vector.load %arg7[%c0_29, %c0_30] : memref<1x1xf32, #tpu.memory_space<vmem>>, vector<1x1xf32>
      tpu.vector_store %arg7[%c0_29, %c0_30], %74 {strides = array<i32>} : memref<1x1xf32, #tpu.memory_space<vmem>>, vector<1x1xf32>,
    } else {
    }
    return
  }
  func.func @transform_0(%arg0: i32, %arg1: i32, %arg2: memref<5x2xf32, #tpu.memory_space<smem>>) -> (i32, i32, i32) {
    %c0_i32 = arith.constant 0 : i32
    %c0_i32_0 = arith.constant 0 : i32
    return %arg0, %c0_i32, %arg1 : i32, i32, i32
  }
  func.func @transform_1(%arg0: i32, %arg1: i32, %arg2: memref<5x2xf32, #tpu.memory_space<smem>>) -> (i32, i32, i32) {
    %c0_i32 = arith.constant 0 : i32
    %c0_i32_0 = arith.constant 0 : i32
    return %arg0, %c0_i32, %arg1 : i32, i32, i32
  }
  func.func @transform_2(%arg0: i32, %arg1: i32, %arg2: memref<5x2xf32, #tpu.memory_space<smem>>) -> (i32, i32) {
    %c0_i32 = arith.constant 0 : i32
    %c0_i32_0 = arith.constant 0 : i32
    %c0_i32_1 = arith.constant 0 : i32
    return %c0_i32, %c0_i32_0 : i32, i32
  }
  func.func @transform_3(%arg0: i32, %arg1: i32, %arg2: memref<5x2xf32, #tpu.memory_space<smem>>) -> (i32, i32) {
    %c0_i32 = arith.constant 0 : i32
    %c0_i32_0 = arith.constant 0 : i32
    %c0_i32_1 = arith.constant 0 : i32
    return %c0_i32, %c0_i32_0 : i32, i32
  }
  func.func @transform_4(%arg0: i32, %arg1: i32, %arg2: memref<5x2xf32, #tpu.memory_space<smem>>) -> (i32, i32) {
    %c0_i32 = arith.constant 0 : i32
    %c0_i32_0 = arith.constant 0 : i32
    %c0_i32_1 = arith.constant 0 : i32
    return %c0_i32, %c0_i32_0 : i32, i32
  }
}

</mosaic_0001>

<bundles_post_ra>
// kernel: tpu_custom_call.1
= control target key start
LH: loop header
LB: loop body
LE: loop exit
PB: predicated region body
PF: predicated region fallthrough
CT: control target
= control target key end

     0   :  { %s1272_s0 = inlined_call_operand.vmem [shape: f32[5,2], index: 0, kind: input, shape index: {}]   ;;  %s1273_s1 = inlined_call_operand.vmem [shape: f32[2,8,384], index: 1, kind: input, shape index: {}]   ;;  %s1274_s2 = inlined_call_operand.hbm [shape: f32[2,8,384], index: 2, kind: input, shape index: {}]   ;;  %s1275_s3 = inlined_call_operand.vmem [shape: f32[32,10], index: 3, kind: input, shape index: {}]   ;;  %s1276_s4 = inlined_call_operand.vmem [shape: f32[8,33], index: 4, kind: input, shape index: {}]   ;;  %s1277_s5 = inlined_call_operand.hbm [shape: f32[1,1], index: 5, kind: output, shape index: {}]  }
   0x1   :  { %1279 = sst [smem:[#allocation12_spill]] %s1273_s1  ;;  %s10_s20 = sshll.u32 %s1272_s0, 4  ;;  %s11_s20 = int_to_ptr.vmem [resolvable:$true] %s10_s20 }
   0x2   :  { %s840_s21 = scalar_lea.vmem %s11_s20, 128  ;;  %p845_p1 = scmp.lt.s32.totalorder %s11_s20, %s11_s20 }
   0x3   :  { %p841_p0 = scmp.ne.s32.totalorder %s11_s20, %s840_s21  ;;  %p846_p2 = scmp.lt.s32.totalorder %s840_s21, %s840_s21 }
   0x5   :  { %p847_p3 = por %p846_p2, %p845_p1 }
   0x7   :  { %p848_p4 = pnand %p847_p3, %p841_p0 }
   0x9   :  { %851 = shalt.err (!%p848_p4)  }
   0xa   :  { %s982_s22 = smov [#allocation4]  }
   0xb   :  { %13 = dma.vmem_to_smem %s11_s20, 128, %s982_s22, [#allocation3] }
   0xc   :  { %940 = dma.done.wait [#allocation3], 128 }
   0xd   :  { %941 = vsyncadd [#allocation3], 4294967168 }
   0xe   :  { %15 = sfence }
   0xf   :  { %16 = vsyncpa [#allocation6], 0 }
  0x10   :  { %18 = vsyncpa [#allocation6 + $0x1], 0 }
  0x11   :  { %19 = vsyncpa [#allocation7], 0  ;;  %s1025_s23 = smov 0   ;;  %s1027_s24 = smov 0  }
  0x12   :  { %s1029_s0 = smov 0   ;;  %s1031_s25 = smov 0  }
  0x13   :  { %s1033_s26 = smov 0   ;;  %s1035_s27 = smov 0  }
  0x14   :  { %s1037_s28 = smov 0   ;;  %s1039_s29 = smov 0  }
  0x15 LB: > { %s1278_s30 = sadd.s32 4294967295, %s980_s29   ;;  %s34_s6 = sadd.s32 1, %s972_s27  ;;  %s980_s29 = sphi %s1039_s29, %s25_s29   ;;  %s976_s28 = sphi %s1037_s28, %s1295_s28   ;;  %s972_s27 = sphi %s1035_s27, %s1294_s27   ;;  %s968_s26 = sphi %s1033_s26, %s1293_s26   ;;  %s964_s25 = sphi %s1031_s25, %s1292_s25   ;;  %s960_s0 = sphi %s1029_s0, %s1291_s0   ;;  %s956_s24 = sphi %s1027_s24, %s1290_s24   ;;  %s952_s23 = sphi %s1025_s23, %s1289_s23  }
  0x16   : > { %p35_p5 = scmp.ge.s32.totalorder %s34_s6, 3  ;;  %s37_s7 = sadd.s32 1, %s976_s28 }
  0x17   : > { %s74_s8 = sadd.s32 1, %s960_s0  ;;  %p81_p6 = scmp.ne.s32.totalorder %s960_s0, %s956_s24 }
  0x18   : > { %s1297_s6 = smov (%p35_p5, %s34_s6), 0  ;;  %s1299_s7 = smov (!%p35_p5, %s37_s7), %s976_s28 }
  0x19   : > { %s70_s9 = ssub.s32 %s972_s27, %s1297_s6  ;;  %p82_p7 = scmp.eq.s32.totalorder %s980_s29, 0 }
  0x1a   : > { %p39_p8 = scmp.ge.s32.totalorder %s1299_s7, 2  ;;  %p87_p9 = scmp.ne.s32.totalorder %s956_s24, %s952_s23 }
  0x1b   : > { %p1076_p10 = por %p82_p7, %p81_p6  ;;  %p88_p11 = scmp.eq.s32.totalorder %s1278_s30, 0 }
  0x1c   : > { %s1301_s7 = smov (%p39_p8, %s1299_s7), 0  ;;  %p750_p13 = scmp.lt.s32.totalorder %s980_s29, 6 }
  0x1d   : > { %p1084_p12 = por %p88_p11, %p87_p9  ;;  %s69_s12 = ssub.s32 %s976_s28, %s1301_s7 }
  0x1e   : > { %s71_s13 = sor.u32 %s70_s9, %s69_s12  ;;  %s191_s14 = sand.u32 1, %s960_s0  }
  0x1f   : > { %p72_p0 = scmp.eq.s32.totalorder %s71_s13, 0  ;;  %s675_s15 = sshll.u32 %s191_s14, 3 }
  0x20   : > { %s736_s16 = smul.u32 3, %s976_s28  ;;  %s195_s20 = scalar_lea.vmem [#allocation5], %s675_s15 }
  0x21   : > { %s1094_s17 = scalar_select %p72_p0, %s960_s0, %s74_s8  }
  0x22   : > { %s200_s18 = sadd.s32 %s972_s27, %s736_s16  ;;  %s204_s21 = sshll.u32 %s195_s20, 4  ;;  %s1102_s21 = int_to_ptr.vmem [resolvable:$true] %s204_s21 }
  0x23   : > { %s676_s19 = sshll.u32 %s200_s18, 7  ;;  %p1108_p1 = pnand %p750_p13, %p1076_p10 }
  0x24   : > { %s1100_s30 = scalar_lea.hbm %s1274_s2, %s676_s19  ;;  %s192_s9 = scalar_lea.sflag [#allocation6], %s191_s14 }
  0x25   : > { %s852_s12 = scalar_lea.hbm %s1100_s30, 128  ;;  %p854_p5 = pneg %p1108_p1 }
  0x26   : > { %p853_p4 = scmp.ne.s32.totalorder %s1100_s30, %s852_s12  ;;  %s857_s15 = scalar_lea.hbm %s1274_s2, 768 }
  0x27   : > { %p858_p8 = scmp.lt.u32.totalorder %s1100_s30, %s1274_s2  ;;  %p859_p9 = scmp.lt.u32.totalorder %s857_s15, %s852_s12 }
  0x28   : > { %p855_p6 = pnand %p854_p5, %p853_p4  ;;  %p861_p11 = scmp.lt.u32.totalorder %s852_s12, %s1100_s30 }
  0x29   : > { %p860_p10 = por %p859_p9, %p858_p8 }
  0x2a   : > { %p856_p7 = pneg %p855_p6 }
  0x2b   : > { %p862_p13 = por %p861_p11, %p860_p10 }
  0x2d   : > { %p863_p0 = pnand %p862_p13, %p856_p7 }
  0x2f   : > { %866 = shalt.err (!%p863_p0)
}
  0x30   : > { %s867_s14 = scalar_lea.vmem %s1102_s21, 128  ;;  %s983_s19 = smov [#allocation5]  }
  0x31   : > { %p868_p4 = scmp.ne.s32.totalorder %s1102_s21, %s867_s14  ;;  %s872_s20 = sshll.u32 %s983_s19, 4  ;;  %s873_s20 = int_to_ptr.vmem [resolvable:$false] %s872_s20 }
  0x32   : > { %s874_s22 = scalar_lea.vmem %s873_s20, 256  ;;  %p875_p3 = scmp.lt.s32.totalorder %s1102_s21, %s873_s20 }
  0x33   : > { %p870_p6 = pnand %p868_p4, %p854_p5  ;;  %p876_p8 = scmp.lt.s32.totalorder %s874_s22, %s867_s14 }
  0x35   : > { %p871_p2 = pneg %p870_p6  ;;  %p877_p9 = por %p876_p8, %p875_p3 }
  0x37   : > { %p878_p10 = pnand %p877_p9, %p871_p2 }
  0x39   : > { %881 = shalt.err (!%p878_p10)
}
  0x3a   : > { %749 = dma.hbm_to_vmem [thread:$0]  (!%p1108_p1), %s1100_s30, 128, %s1102_s21, %s192_s9  }
  0x3b   : > { %p1283_p7 = scmp.lt.s32.totalorder %s980_s29, 7  ;;  %p1284_p11 = scmp.ge.s32.totalorder %s980_s29, 1 }
  0x3d   : > { %p210_p5 = pnand %p1284_p11, %p1283_p7 }
  0x3e   : > { %s215_s23 = sand.u32 (!%p210_p5), 1, %s956_s24  }
  0x3f   : > { %213 = sbr.rel (%p210_p5) target bundleno = 814 (0x32e), region = 36  ;;  %s1144_s12 = sshll.u32 (!%p210_p5), %s215_s23, 3 }
  0x40   : > { %s216_s13 = scalar_lea.sflag (!%p210_p5), [#allocation6], %s215_s23  ;;  %s219_s10 = scalar_lea.vmem (!%p210_p5), [#allocation5], %s1144_s12 }
  0x46   : > { %943 = dma.done.wait (%p1084_p12), %s216_s13, 128  }
  0x47   : > { %945 = vsyncadd (%p1084_p12), %s216_s13, 4294967168  ;;  %p247_p1 = scmp.lt.s32.totalorder %s968_s26, 1  ;;  %p249_p2 = scmp.lt.s32.totalorder %s964_s25, 2 }
  0x48   : > { %p255_p3 = scmp.eq.s32.totalorder %s968_s26, 0  ;;  %p256_p13 = scmp.eq.s32.totalorder %s964_s25, 0 }
  0x49   : > { %s248_s30 = scalar_select %p247_p1, %s968_s26, 1 }
  0x4a   : > { %s250_s21 = scalar_select %p249_p2, %s964_s25, 2 }
  0x4b   : > { %s737_s8 = smul.u32 3, %s248_s30  ;;  %p257_p0 = pnand %p256_p13, %p255_p3 }
  0x4c   : > { %s1285_s1 = sld [smem:[#allocation12_spill]]  ;;  %vm261_vm0 = vcmask (!%p257_p0), 0   ;;  %v984_v0 = vmov (!%p257_p0), 0.0  }
  0x4d   : > { %s252_s9 = sadd.s32 %s737_s8, %s250_s21  ;;  %260 = sbr.rel (%p257_p0) target bundleno = 84 (0x54), region = 44  ;;  %262 = vst.msk [vmem:[#allocation2] sm:$0x1] (!%p257_p0), %vm261_vm0, %v984_v0 }
  0x4e   : > { %s679_s15 = sshll.u32 %s252_s9, 3 }
  0x52   : > { %s254_s11 = scalar_lea.vmem %s1285_s1, %s679_s15 }
  0x54 PF: > { %s263_s14 = sld [smem:[#allocation4 + %s968_s26]]  ;;  %s264_s19 = sshra.s32 %s968_s26, 7  ;;  %v291_v1 = vld [vmem:[%s1275_s3] sm:$0xff]  ;;  %vm316_vm1 = vcmask 64512   ;;  %v294_v2 = vld [vmem:[%s1275_s3 + $0x18] sm:$0xff]  ;;  %v985_v3 = vmov 8  }
  0x55   : > { %s1165_s23 = sshll.u32 %s264_s19, 7  ;;  %s1168_s13 = sand.u32 127, %s968_s26  ;;  %713 = vmatprep.mubr.msk.f32.mxu0 %vm316_vm1, %v291_v1  ;;  %827 = vset.pattern.permute.xlu1 %v985_v3  ;;  %v285_v4 = vld [vmem:[%s219_s10] sm:$0xff]  ;;  %v292_v7 = vld [vmem:[%s1275_s3 + $0x8] sm:$0xff]  ;;  %v986_v9 = vmov 9   ;;  %v987_v22 = vmov 0.0|0.0  }
  0x56   : > { %s696_s30 = sadd.s32 256, %s1165_s23  ;;  %s698_s21 = sadd.s32 384, %s1165_s23  ;;  %826 = vset.pattern.permute.xlu0 %v985_v3  ;;  %313 = vperm.xlu1 %827, %v294_v2   ;;  %v1181_v5 = vld [vmem:[%s254_s11] sm:$0xff]  ;;  %v293_v13 = vld [vmem:[%s1275_s3 + $0x10] sm:$0xff]  ;;  %vm988_vm2 = vmmov 0   ;;  %v989_v23 = vmov 0.0  }
  0x57   : > { %s274_s15 = sadd.s32 %s696_s30, %s1168_s13  ;;  %s278_s16 = sadd.s32 %s698_s21, %s1168_s13  ;;  %298 = vperm.xlu0 %826, %v291_v1   ;;  %730 = vmatprep.subr.bf16.mxu1 %v987_v22  ;;  %v1202_v24 = vld [vmem:[%s1276_s4] sm:$0xff]  ;;  %v990_v25 = vmov 32   ;;  %vm480_vm3 = vcmask 261120   ;;  %vm572_vm4 = vcmask 0  }
  0x58   : > { %s275_s18 = sld [smem:[#allocation4 + %s274_s15]]  ;;  %s694_s20 = sadd.s32 128, %s1165_s23  ;;  %727 = vmatprep.mubr.msk.f32.mxu1 %vm988_vm2, %v989_v23 }
  0x59   : > { %s279_s19 = sld [smem:[#allocation4 + %s278_s16]]  ;;  %s270_s8 = sadd.s32 %s694_s20, %s1168_s13 }
  0x5a   : > { %v286_v6 = vstv %s263_s14  ;;  %828 = vset.pattern.permute.xlu1 %v986_v9  ;;  %s271_s30 = sld [smem:[#allocation4 + %s270_s8]]  ;;  %s700_s14 = sadd.s32 512, %s1165_s23 }
  0x5b   : > { %v287_v8 = vmul.f32 %v286_v6, %v285_v4  ;;  %303 = vperm.xlu0 %826, %v292_v7   ;;  %s282_s21 = sadd.s32 %s700_s14, %s1168_s13  ;;  %p574_p12 = scmp.eq.s32.totalorder %s968_s26, 1 }
  0x5c   : > { %s283_s9 = sld [smem:[#allocation4 + %s282_s21]]  ;;  %p575_p4 = scmp.eq.s32.totalorder %s964_s25, 2 }
  0x5d   : > { %v288_v10 = vadd.f32 %v287_v8, %v1181_v5 }
  0x5e   : > { %v553_v12 = vstv %s275_s18  ;;  %p1214_p6 = pnand %p575_p4, %p574_p12 }
  0x5f   : > { %v289_v11 = vstv %s279_s19  ;;  %v1191_v15 = vmul.f32 %v553_v12, %v288_v10  ;;  %308 = vperm.xlu0 %826, %v293_v13  }
  0x60   : > { %v290_v14 = vmul.f32 %v289_v11, %v288_v10  ;;  %v410_v17 = vstv %s271_s30 }
  0x61   : > { %v555_v16 = vsub.f32 %v1181_v5, %v1191_v15  ;;  %v411_v18 = vmul.f32 %v410_v17, %v291_v1  ;;  %v413_v19 = vmul.f32 %v410_v17, %v293_v13  ;;  %v412_v20 = vmul.f32 %v410_v17, %v292_v7  ;;  %v559_v15 = vld [vmem:[#allocation2] sm:$0x1] }
  0x62   : > { %711 = vmatprep.subr.mxu0 %v290_v14  ;;  %v414_v21 = vmul.f32 %v410_v17, %v294_v2 }
  0x63   : > { %712 = vmatpush3.msra.mxu0 %v290_v14  ;;  %829 = vset.pattern.permute.xlu0 %v986_v9 }
  0x64   : > { %714 = vmatmul.mubr.msk.f32.vlgmr.msra.gmra.mrb[0].mxu0 %vm316_vm1, %v292_v7  ;;  %417 = vperm.xlu1 %828, %v411_v18  }
  0x65   : > { %716 = vmatprep.mubr.msk.f32.mxu0 %vm316_vm1, %v293_v13  ;;  %427 = vperm.xlu0 %829, %v413_v19  }
  0x68   : > { %717 = vmatmul.mubr.msk.f32.gmra.mrb[2].mxu0 %vm316_vm1, %v294_v2  ;;  %422 = vperm.xlu1 %828, %v412_v20  }
  0x69   : > { %831 = vset.pattern.permute.xlu0 %v990_v25 }
  0x6c   : > { %432 = vperm.xlu1 %828, %v414_v21  }
  0x70   : > { %830 = vset.pattern.permute.xlu1 %v990_v25  ;;  %v556_v25 = vstv %s283_s9 }
  0x71   : > { %477 = vperm.xlu1 %830, %v1202_v24  }
  0xd5   : > { %v314_v26 = vpop.permute.xlu1 %313 }
  0xd6   : > { %v299_v27 = vpop.permute.xlu0 %298 }
  0xda   : > { %v304_v29 = vpop.permute.xlu0 %303 }
  0xde   : > { %v309_v32 = vpop.permute.xlu0 %308 }
  0xe3   : > { %v418_v28 = vpop.permute.xlu1 %417 }
  0xe4   : > { %v428_v42 = vpop.permute.xlu0 %427 }
  0xe7   : > { %v423_v30 = vpop.permute.xlu1 %422 }
  0xeb   : > { %v433_v43 = vpop.permute.xlu1 %432 }
 0x137   : > { %v715_v31 = vpop.f32.mrb[0].mxu0 }
 0x138   : > { %v397_v33 = vadd.f32 %v715_v31, %v304_v29  ;;  %v391_v34 = vpop.f32.mrb[1].mxu0 }
 0x139   : > { %v392_v35 = vadd.f32 %v391_v34, %v299_v27  ;;  %v557_v27 = vmul.f32 %v556_v25, %v555_v16 }
 0x13a   : > { %v436_v36 = vadd.f32 %v423_v30, %v397_v33 }
 0x13b   : > { %v435_v37 = vadd.f32 %v418_v28, %v392_v35  ;;  %v718_v38 = vpop.f32.mrb[2].mxu0 }
 0x13c   : > { %v440_v39 = vmul.f32 %v436_v36, %v436_v36  ;;  %v407_v40 = vadd.f32 %v718_v38, %v314_v26  ;;  %v401_v41 = vpop.f32.mrb[3].mxu0  ;;  %v478_v26 = vpop.permute.xlu1 %477 }
 0x13d   : > { %v439_v44 = vmul.f32 %v435_v37, %v435_v37  ;;  %v402_v45 = vadd.f32 %v401_v41, %v309_v32 }
 0x13e   : > { %v444_v46 = vmul.f32 %v440_v39, %v436_v36  ;;  %v438_v47 = vadd.f32 %v433_v43, %v407_v40 }
 0x13f   : > { %v443_v48 = vmul.f32 %v439_v44, %v435_v37  ;;  %v437_v49 = vadd.f32 %v428_v42, %v402_v45 }
 0x140   : > { %v448_v50 = vmul.f32 0.044715, %v444_v46  ;;  %v442_v51 = vmul.f32 %v438_v47, %v438_v47 }
 0x141   : > { %v447_v52 = vmul.f32 0.044715, %v443_v48  ;;  %v441_v53 = vmul.f32 %v437_v49, %v437_v49 }
 0x142   : > { %v446_v54 = vmul.f32 %v442_v51, %v438_v47  ;;  %v452_v55 = vadd.f32 %v448_v50, %v436_v36 }
 0x143   : > { %v445_v56 = vmul.f32 %v441_v53, %v437_v49  ;;  %v451_v57 = vadd.f32 %v447_v52, %v435_v37 }
 0x144   : > { %v450_v58 = vmul.f32 0.044715, %v446_v54  ;;  %v456_v59 = vmul.f32 0.7978846, %v452_v55 }
 0x145   : > { %v449_v60 = vmul.f32 0.044715, %v445_v56  ;;  %v455_v61 = vmul.f32 0.7978846, %v451_v57 }
 0x146   : > { %v454_v62 = vadd.f32 %v450_v58, %v438_v47  ;;  %832 = vtanh.f32 %v456_v59 }
 0x147   : > { %v453_v63 = vadd.f32 %v449_v60, %v437_v49  ;;  %834 = vtanh.f32 %v455_v61 }
 0x148   : > { %v458_v0 = vmul.f32 0.7978846, %v454_v62 }
 0x149   : > { %v457_v1 = vmul.f32 0.7978846, %v453_v63 }
 0x14a   : > { %836 = vtanh.f32 %v458_v0 }
 0x14b   : > { %838 = vtanh.f32 %v457_v1 }
 0x150   : > { %v833_v2 = vpop.eup %832 }
 0x151   : > { %v835_v3 = vpop.eup %834  ;;  %v464_v4 = vadd.f32 1.0, %v833_v2 }
 0x152   : > { %v463_v6 = vadd.f32 1.0, %v835_v3 }
 0x153   : > { %v468_v7 = vmul.f32 0.5, %v464_v4 }
 0x154   : > { %v837_v8 = vpop.eup %836  ;;  %v467_v9 = vmul.f32 0.5, %v463_v6 }
 0x155   : > { %v839_v10 = vpop.eup %838  ;;  %v472_v11 = vmul.f32 %v468_v7, %v436_v36  ;;  %v466_v12 = vadd.f32 1.0, %v837_v8 }
 0x156   : > { %v471_v13 = vmul.f32 %v467_v9, %v435_v37  ;;  %v465_v14 = vadd.f32 1.0, %v839_v10 }
 0x157   : > { %v470_v17 = vmul.f32 0.5, %v466_v12 }
 0x158   : > { %v731_v18 = vpack.c.bf16 %v472_v11, %v471_v13  ;;  %v469_v19 = vmul.f32 0.5, %v465_v14 }
 0x159   : > { %v474_v20 = vmul.f32 %v470_v17, %v438_v47 }
 0x15a   : > { %732 = vmatpush3.bf16.msra.mxu1 %v731_v18  ;;  %v473_v21 = vmul.f32 %v469_v19, %v437_v49 }
 0x15b   : > { %733 = vmatprep.subr.bf16.mxu1 %v987_v22 }
 0x15c   : > { %v734_v23 = vpack.c.bf16 %v474_v20, %v473_v21 }
 0x15e   : > { %735 = vmatpush3.bf16.msra.mxu1 %v734_v23 }
 0x161   : > { %728 = vmatmul.mubr.msk.f32.vlgmr.msra.gmra.mrb[0].mxu1 %vm480_vm3, %v1202_v24 }
 0x234   : > { %v549_v28 = vpop.f32.mrb[0].mxu1 }
 0x235   : > { %v550_v29 = vadd.f32 %v549_v28, %v478_v26  ;;  %v729_v30 = vpop.f32.mrb[1].mxu1 }
 0x237   : > { %v558_v22 = vsub.f32 %v550_v29, %v557_v27 }
 0x239   : > { %v560_v31 = vmul.f32 %v558_v22, %v558_v22 }
 0x23b   : > { %561 = vadd.xlane.f32.xlu0 %v560_v31 }
 0x2c8   : > { %v562_v24 = vpop.xlane.xlu0 %561 }
 0x2c9   : > { %v563_v32 = vrot.slane %v562_v24, 4 }
 0x2cb   : > { %v564_v33 = vadd.f32 %v563_v32, %v562_v24 }
 0x2cd   : > { %v565_v34 = vrot.slane %v564_v33, 2 }
 0x2cf   : > { %v566_v35 = vadd.f32 %v565_v34, %v564_v33 }
 0x2d1   : > { %v567_v36 = vrot.slane %v566_v35, 1 }
 0x2d3   : > { %v568_v5 = vadd.f32 %v567_v36, %v566_v35 }
 0x2d5   : > { %738 = vpush %v568_v5 }
 0x304   : > { %579 = sbr.rel (%p1214_p6) target bundleno = 789 (0x315), region = 48 }
 0x306   : > { %s739_s23 = spop %738 }
 0x307   : > { %v570_v16 = vstv %s739_s23 }
 0x308   : > { %v571_v37 = vadd.f32 %v570_v16, %v559_v15 }
 0x30a   : > { %573 = vst.msk [vmem:[#allocation2] sm:$0x1] %vm572_vm4, %v571_v37 }
 0x311   : > { %v580_v38 = vld [vmem:[#allocation2] sm:$0x1] }
 0x312   : > { %v581_v39 = vmul.f32 0.00016276042, %v580_v38 }
 0x314   : > { %582 = vst.msk [vmem:[#allocation8] sm:$0x1] %vm572_vm4, %v581_v39 }
 0x315 PF: > { %s1287_s25 = sadd.s32 4294967295, %s980_s29   ;;  %s991_s13 = smov [#allocation8]  }
 0x316   : > { %p1222_p8 = scmp.eq.s32.totalorder %s1287_s25, 5  ;;  %s590_s16 = sshll.u32 %s991_s13, 4  ;;  %s591_s16 = int_to_ptr.vmem [resolvable:$true] %s590_s16 }
 0x317   : > { %s882_s18 = scalar_lea.vmem %s591_s16, 16  ;;  %s888_s19 = scalar_lea.vmem %s591_s16, 32 }
 0x318   : > { %p883_p9 = scmp.ne.s32.totalorder %s591_s16, %s882_s18  ;;  %p889_p11 = scmp.lt.s32.totalorder %s591_s16, %s591_s16 }
 0x319   : > { %p890_p5 = scmp.lt.s32.totalorder %s888_s19, %s882_s18 }
 0x31a   : > { %p884_p10 = pnand %p883_p9, %p1222_p8 }
 0x31b   : > { %p891_p1 = por %p890_p5, %p889_p11 }
 0x31c   : > { %p885_p7 = pneg %p884_p10 }
 0x31e   : > { %p892_p2 = pnand %p891_p1, %p885_p7 }
 0x320   : > { %895 = shalt.err (!%p892_p2)
}
 0x321   : > { %s896_s8 = scalar_lea.hbm %s1277_s5, 16 }
 0x322   : > { %p897_p3 = scmp.ne.s32.totalorder %s1277_s5, %s896_s8  ;;  %p902_p12 = scmp.lt.u32.totalorder %s896_s8, %s1277_s5 }
 0x324   : > { %p898_p13 = pnand %p897_p3, %p1222_p8 }
 0x326   : > { %p899_p0 = pneg %p898_p13 }
 0x328   : > { %p904_p4 = pnand %p902_p12, %p899_p0 }
 0x32a   : > { %907 = shalt.err (!%p904_p4)
}
 0x32b   : > { %743 = dma.vmem_to_hbm [thread:$0]  (%p1222_p8), %s591_s16, 16, %s1277_s5, [#allocation7]  }
 0x32c   : > { %947 = dma.done.wait (%p1222_p8), [#allocation7], 16  }
 0x32d   : > { %949 = vsyncadd (%p1222_p8), [#allocation7], 4294967280 }
 0x32e PF: > { %s25_s29 = sadd.s32 1, %s980_s29   ;;  %s1289_s23 = smov %s956_s24 }
 0x32f   : > { %p22_p6 = scmp.ge.s32.totalorder %s25_s29, 8   ;;  %s1290_s24 = smov %s960_s0 }
 0x330   : > { %s1291_s0 = smov %s1094_s17  ;;  %s1292_s25 = smov %s972_s27 }
 0x331   : > { %s1293_s26 = smov %s976_s28  ;;  %s1294_s27 = smov %s1297_s6 }
 0x332   : > { %s1295_s28 = smov %s1301_s7  ;;  %24 = sbr.rel (!%p22_p6) target bundleno = 21 (0x15), region = 84 }
 0x339   :  { %603 = vsyncpa [#allocation6], 1 }
 0x33a   :  { %605 = vsyncpa [#allocation6 + $0x1], 1 }
 0x33b   :  { %606 = vsyncpa [#allocation7], 1 }
 0x33c   :  { %608 = vsyncpa [#allocation7 + $0x1], 1 }

</bundles_post_ra>
